<compile_context>
chip_gen: v5e
topology: v5e:2x2
jax: 0.10.0
libtpu: 0.0.40
codegen_flags: <defaults>
</compile_context>

<pallas_src>
import functools

import numpy as np

import jax
import jax.numpy as jnp
from jax import lax
from jax.experimental import pallas as pl
from jax.experimental.pallas import tpu as pltpu


def _round_up(x, m):
    return ((x + m - 1) // m) * m


def _vmem_limit(nbytes):
    # Scoped-VMEM request derived from the actual block working set (+ slack).
    return int(min(100 * 1024 * 1024, max(int(nbytes) + (4 << 20), 32 << 20)))


# ---------------------------------------------------------------------------
# Kernel 1: feature stem conv (matmul over im2col patches, M-major so there is
# no HBM transpose) fused with the matching conv's per-tap channel projection.
# Two chained MXU matmuls per tile; output [T, TM] is lane-dense.
# ---------------------------------------------------------------------------
def _feature_tap_kernel(p_ref, wfT_ref, bT_ref, wtap_ref, o_ref):
    # p_ref:    [TM, K]  im2col patches (M-major, no transpose in HBM)
    # wfT_ref:  [C, K]   stem weights,  bT_ref: [C, 1] bias
    # wtap_ref: [T=27,C] per-tap channel projection of the matching conv
    # o_ref:    [T, TM]  lane-dense (TM is a multiple of 128)
    feat = lax.dot_general(wfT_ref[...], p_ref[...],
                           dimension_numbers=(((1,), (1,)), ((), ())),
                           preferred_element_type=jnp.float32)       # [C, TM]
    feat = jnp.maximum(feat + bT_ref[...], 0.0)
    o_ref[...] = jnp.dot(wtap_ref[...], feat, preferred_element_type=jnp.float32)


def feature_and_tap(img_nchw, w_feat, b_feat, wtap):
    """3x3 stride-3 pad-1 conv + ReLU, fused with the matching conv's channel
    contraction.  Returns g[B, T=27, Hf, Wf] (tap-projected features)."""
    B, Cin, H, W = img_nchw.shape
    Cf = w_feat.shape[-1]
    T = wtap.shape[0]

    x = jnp.transpose(img_nchw, (0, 2, 3, 1))                        # NHWC
    xp = jnp.pad(x, ((0, 0), (1, 1), (1, 1), (0, 0)))
    Ho = (H + 2 - 3) // 3 + 1
    Wo = (W + 2 - 3) // 3 + 1
    cols = [xp[:, kh:kh + 3 * Ho:3, kw:kw + 3 * Wo:3, :]
            for kh in range(3) for kw in range(3)]
    K = 9 * Cin
    M = B * Ho * Wo
    patches = jnp.concatenate(cols, axis=-1).reshape(M, K)           # [M, K]

    TM = min(2048, _round_up(M, 128))            # large lane-dense M tiles
    Mpad = _round_up(M, TM)
    if Mpad > M:
        patches = jnp.pad(patches, ((0, Mpad - M), (0, 0)))

    w2dT = w_feat.reshape(K, Cf).T                                   # [C, K]
    bT = b_feat.reshape(Cf, 1)

    blk_bytes = 4 * (2 * TM * K + K * Cf + Cf + T * Cf + 2 * T * TM)
    gT = pl.pallas_call(
        _feature_tap_kernel,
        out_shape=jax.ShapeDtypeStruct((T, Mpad), jnp.float32),
        grid=(Mpad // TM,),
        in_specs=[
            pl.BlockSpec((TM, K), lambda i: (i, 0)),
            pl.BlockSpec((Cf, K), lambda i: (0, 0)),   # resident across tiles
            pl.BlockSpec((Cf, 1), lambda i: (0, 0)),   # resident across tiles
            pl.BlockSpec((T, Cf), lambda i: (0, 0)),   # resident across tiles
        ],
        out_specs=pl.BlockSpec((T, TM), lambda i: (0, i)),
        compiler_params=pltpu.CompilerParams(
            dimension_semantics=("parallel",),
            vmem_limit_bytes=_vmem_limit(blk_bytes)),
        cost_estimate=pl.CostEstimate(
            flops=int(2 * Mpad * K * Cf + 2 * Mpad * Cf * T),
            transcendentals=0,
            bytes_accessed=int(4 * (Mpad * K + K * Cf + Cf + T * Cf + T * Mpad))),
    )(patches, w2dT, bT, wtap)

    g = gT[:, :M].reshape(T, B, Ho, Wo)
    g = jnp.transpose(g, (1, 0, 2, 3))                               # [B, T, Hf, Wf]
    return g, Ho, Wo


# ---------------------------------------------------------------------------
# Kernel 2: fused cost-volume construction + 3x3x3 matching conv.
#   cost[b, :C, i, h, w] = x[b,:,h,w]   if w >= i else 0
#   cost[b, C:, i, h, w] = y[b,:,h,w-i] if w >= i else 0
#   m = conv3d(cost, w_match)  (pad 1, single output channel)
# The channel contraction is folded into gx/gy (kernel 1) and the kh-reduction
# of the 27 tap planes is hoisted out of the kernel (9 (kd,kw) planes each).
# The disparity axis sits on the grid, TD planes per step; the d-dependent
# shift of the right image is pre-windowed per d-tile so all in-kernel slices
# are static, and the 9 per-tap masks are grouped into 5 shift-group masks.
# ---------------------------------------------------------------------------
def _cost_matching_kernel(sx_ref, syw_ref, o_ref, *, D, TD, OFF, Hf, Wf):
    # sx_ref:  [9, Hf, Wf]   left  kh-summed (kd,kw) planes (padding baked in)
    # syw_ref: [9, Hf, WW]   right kh-summed planes, windowed for this d-tile
    # o_ref:   [TD, Hf, Wf]
    d_base = pl.program_id(1) * TD
    for dd in range(TD):
        d = d_base + dd
        # Re-derived per plane so nothing large stays live across the unroll.
        wiota = lax.broadcasted_iota(jnp.int32, (Hf, Wf), 1)
        lastcol = (wiota < (Wf - 1)).astype(jnp.float32)
        acc = jnp.zeros((Hf, Wf), jnp.float32)
        # Group the 9 (kd, kw) taps by o = kw - kd: one shift mask per group.
        for o in range(-2, 3):
            off = OFF + o - dd                         # static window offset
            grp = None
            for kd in range(3):
                kw = kd + o
                if kw < 0 or kw > 2:
                    continue
                g = kd * 3 + kw
                i = d + kd - 1                         # cost-volume plane
                vf = jnp.logical_and(i >= 0, i < D).astype(jnp.float32)
                ysl = syw_ref[g, :, off:off + Wf]      # static slice
                if kw == 2:
                    # Right-edge column: the shifted y read is real data for
                    # i >= 1 but the cost volume is zero there.
                    ysl = ysl * lastcol
                contrib = vf * (sx_ref[g] + ysl)
                grp = contrib if grp is None else grp + contrib
            acc = acc + jnp.where(wiota >= (d - o), grp, 0.0)
        o_ref[dd] = acc


def cost_volume_matching(gx, gy, D):
    """Fused cost volume + matching conv.  gx/gy: [B,27,Hf,Wf] -> [B,Dpad,Hf,Wf]."""
    B, T, Hf, Wf = gx.shape
    TD = min(16, D)                       # disparity planes per grid step
    Dpad = _round_up(D, TD)
    nDt = Dpad // TD
    OFF = TD + 1
    WW = TD + 3 + Wf                      # per-tile window width on y

    # Hoisted kh-reduction: 27 tap planes -> 9 (kd, kw) planes per image, with
    # the spatial/disparity zero padding baked in (XLA glue, cheap).
    gxp = jnp.pad(gx, ((0, 0), (0, 0), (1, 1), (1, 1)))
    sx = jnp.stack(
        [sum(gxp[:, kd * 9 + kh * 3 + kw, kh:kh + Hf, kw:kw + Wf]
             for kh in range(3))
         for kd in range(3) for kw in range(3)], axis=1)             # [B,9,Hf,Wf]

    PL = D + OFF
    gyp = jnp.pad(gy, ((0, 0), (0, 0), (1, 1), (PL, 2)))
    sy = jnp.stack(
        [sum(gyp[:, kd * 9 + kh * 3 + kw, kh:kh + Hf, :]
             for kh in range(3))
         for kd in range(3) for kw in range(3)], axis=1)             # [B,9,Hf,PL+Wf+2]
    # Pre-windowed right-image planes: one static window per disparity tile so
    # every in-kernel slice offset is compile-time constant.
    syw = jnp.stack([sy[:, :, :, D - dt * TD: D - dt * TD + WW]
                     for dt in range(nDt)], axis=1)                  # [B,nDt,9,Hf,WW]

    kernel = functools.partial(_cost_matching_kernel,
                               D=D, TD=TD, OFF=OFF, Hf=Hf, Wf=Wf)
    blk_bytes = 4 * (2 * 9 * Hf * Wf + 2 * 9 * Hf * WW + 2 * TD * Hf * Wf)
    out = pl.pallas_call(
        kernel,
        out_shape=jax.ShapeDtypeStruct((B, Dpad, Hf, Wf), jnp.float32),
        grid=(B, nDt),
        in_specs=[
            # Resident per batch element (index constant along the d axis).
            pl.BlockSpec((None, 9, Hf, Wf), lambda b, dt: (b, 0, 0, 0)),
            # Re-fetched per disparity tile.
            pl.BlockSpec((None, None, 9, Hf, WW), lambda b, dt: (b, dt, 0, 0, 0)),
        ],
        out_specs=pl.BlockSpec((None, TD, Hf, Wf), lambda b, dt: (b, dt, 0, 0)),
        compiler_params=pltpu.CompilerParams(
            dimension_semantics=("parallel", "parallel"),
            vmem_limit_bytes=_vmem_limit(blk_bytes)),
        cost_estimate=pl.CostEstimate(
            flops=int(B * Dpad * Hf * Wf * 50),
            transcendentals=0,
            bytes_accessed=int(4 * (B * 9 * Hf * Wf + B * nDt * 9 * Hf * WW
                                    + B * Dpad * Hf * Wf))),
    )(sx, syw)
    # TODO(synk): for production Hf x Wf, also tile Hf with a 1-row halo.
    return out                                   # planes >= D (if any) are padding


# ---------------------------------------------------------------------------
# Kernel 3: fused trilinear upsample (align_corners=False) + softmin over
# disparities + disparity regression.  The upsampled [B, maxdisp, H, W] volume
# never touches HBM; spatial interpolation is two chained MXU matmuls per
# coarse plane over a large H tile; the D->maxdisp lerp + softmin runs online
# so no maxdisp-sized scratch is allocated.
# ---------------------------------------------------------------------------
def _linear_interp_1d(out_size, in_size):
    """PyTorch F.interpolate(align_corners=False) linear sampling positions."""
    scale = in_size / out_size
    src = (np.arange(out_size, dtype=np.float64) + 0.5) * scale - 0.5
    src = np.clip(src, 0.0, in_size - 1)
    i0 = np.floor(src).astype(np.int64)
    i0 = np.minimum(i0, in_size - 1)
    i1 = np.minimum(i0 + 1, in_size - 1)
    frac = (src - i0).astype(np.float32)
    return i0, i1, frac


def _upsample_softmin_kernel(m_ref, rh_ref, rwT_ref, o_ref, up_ref,
                             *, D, d0, d1, w1):
    # m_ref:   [Dpad, Hf, Wf]  coarse matching cost (resident per batch elem)
    # rh_ref:  [TH, Hf]        per-tile H interpolation matrix
    # rwT_ref: [Wf, Wp]        W interpolation matrix (transposed, lane-dense)
    # o_ref:   [TH, Wp]        regressed disparity tile
    # up_ref:  [D, TH, Wp]     scratch (spatially upsampled coarse volume)
    for d in range(D):
        rows = jnp.dot(rh_ref[...], m_ref[d], preferred_element_type=jnp.float32)
        up_ref[d] = jnp.dot(rows, rwT_ref[...], preferred_element_type=jnp.float32)

    MD = len(d0)

    def cost(md):                           # static D -> maxdisp lerp weights
        a, b = 1.0 - w1[md], w1[md]
        return a * up_ref[d0[md]] + b * up_ref[d1[md]]

    # Online softmin + disparity regression (no [MD, TH, Wp] intermediate).
    mn = cost(0)
    for md in range(1, MD):
        mn = jnp.minimum(mn, cost(md))
    den = jnp.zeros_like(mn)
    num = jnp.zeros_like(mn)
    for md in range(MD):
        e = jnp.exp(mn - cost(md))
        den = den + e
        if md:
            num = num + float(md) * e
    o_ref[...] = num * pl.reciprocal(den, approx=True)


def upsample_softmin_regression(m, D, maxdisp, H, W):
    B, Dpad, Hf, Wf = m.shape
    MD = maxdisp
    Wp = _round_up(W, 128)                     # lane-dense output stores

    # Big H tiles for MXU utilization, capped by a VMEM budget for the scratch.
    tile_h = min(256, _round_up(H, 8))
    while tile_h > 8 and D * tile_h * Wp * 4 > (16 << 20):
        tile_h //= 2
    tile_h = max(8, (tile_h // 8) * 8)
    Hpad = _round_up(H, tile_h)

    i0h, i1h, fh = _linear_interp_1d(H, Hf)
    Rh = np.zeros((Hpad, Hf), np.float32)
    np.add.at(Rh, (np.arange(H), i0h), 1.0 - fh)
    np.add.at(Rh, (np.arange(H), i1h), fh)

    i0w, i1w, fw = _linear_interp_1d(W, Wf)
    RwT = np.zeros((Wf, Wp), np.float32)
    np.add.at(RwT, (i0w, np.arange(W)), 1.0 - fw)
    np.add.at(RwT, (i1w, np.arange(W)), fw)

    i0d, i1d, fd = _linear_interp_1d(MD, D)
    kernel = functools.partial(
        _upsample_softmin_kernel, D=D,
        d0=tuple(int(v) for v in i0d),
        d1=tuple(int(v) for v in i1d),
        w1=tuple(float(v) for v in fd))

    blk_bytes = 4 * (2 * Dpad * Hf * Wf + 2 * tile_h * Hf + 2 * Wf * Wp
                     + 2 * tile_h * Wp + D * tile_h * Wp)
    out = pl.pallas_call(
        kernel,
        out_shape=jax.ShapeDtypeStruct((B, Hpad, Wp), jnp.float32),
        grid=(B, Hpad // tile_h),
        in_specs=[
            # TODO(synk): on v7x (64 MiB VMEM) slice m along Hf with a halo
            # (Rh is banded) instead of keeping the full coarse volume
            # resident per batch element.
            pl.BlockSpec((None, Dpad, Hf, Wf), lambda b, h: (b, 0, 0, 0)),
            pl.BlockSpec((tile_h, Hf), lambda b, h: (h, 0)),
            pl.BlockSpec((Wf, Wp), lambda b, h: (0, 0)),
        ],
        out_specs=pl.BlockSpec((None, tile_h, Wp), lambda b, h: (b, h, 0)),
        scratch_shapes=[pltpu.VMEM((D, tile_h, Wp), jnp.float32)],
        compiler_params=pltpu.CompilerParams(
            dimension_semantics=("parallel", "parallel"),
            vmem_limit_bytes=_vmem_limit(blk_bytes)),
        cost_estimate=pl.CostEstimate(
            flops=int(B * (2 * D * Hpad * Hf * Wf + 2 * D * Hpad * Wf * Wp
                           + 12 * MD * Hpad * Wp)),
            transcendentals=int(B * MD * Hpad * Wp),
            bytes_accessed=int(4 * (B * Dpad * Hf * Wf + Hpad * Hf + Wf * Wp
                                    + B * Hpad * Wp))),
    )(m, jnp.asarray(Rh), jnp.asarray(RwT))
    return out[:, :H, :W]


# ---------------------------------------------------------------------------
# Full forward pass
# ---------------------------------------------------------------------------
def lea_stereo_forward(x_nchw, y_nchw, params, maxdisp, maxdisp_downsampling):
    w_feat, b_feat, w_match = params
    B, Cin, H, W = x_nchw.shape
    Cf = w_feat.shape[-1]
    D = int(maxdisp // maxdisp_downsampling)

    # Matching-conv weights split into left (x) / right (y) channel halves and
    # flattened over the 27 spatial taps (kd, kh, kw).
    wx = w_match[..., :Cf].reshape(27, Cf)
    wy = w_match[..., Cf:].reshape(27, Cf)

    gx, Hf, Wf = feature_and_tap(x_nchw, w_feat, b_feat, wx)    # [B, 27, Hf, Wf]
    gy, _, _ = feature_and_tap(y_nchw, w_feat, b_feat, wy)

    m = cost_volume_matching(gx, gy, D)                         # [B, Dpad, Hf, Wf]
    disp = upsample_softmin_regression(m, D, maxdisp, H, W)     # [B, H, W]
    return disp


if __name__ == "__main__":
    key = jax.random.PRNGKey(0)
    B, Cin, H, W = 2, 3, 24, 24
    maxdisp, maxdisp_downsampling = 12, 3
    Cfeat = 8

    k1, k2, k3, k4, k5 = jax.random.split(key, 5)
    left = jax.random.normal(k1, (B, Cin, H, W), jnp.float32)
    right = jax.random.normal(k2, (B, Cin, H, W), jnp.float32)

    # Deterministic synthetic parameters (shapes implied by the module).
    w_feat = 0.1 * jax.random.normal(k3, (3, 3, Cin, Cfeat), jnp.float32)
    b_feat = 0.01 * jax.random.normal(k4, (Cfeat,), jnp.float32)
    w_match = 0.1 * jax.random.normal(k5, (3, 3, 3, 2 * Cfeat), jnp.float32)

    out = lea_stereo_forward(left, right, (w_feat, b_feat, w_match),
                             maxdisp, maxdisp_downsampling)
    jax.block_until_ready(out)
    assert out.shape == (B, H, W)
    assert bool(jnp.all(jnp.isfinite(out)))
    print("KERNEL_OK")
</pallas_src>

<mosaic_0001>
module attributes {stable_mosaic.version = 11 : i64} {
  func.func @_feature_tap_kernel(%arg0: i32, %arg1: memref<128x27xf32, #tpu.memory_space<vmem>>, %arg2: memref<8x27xf32, #tpu.memory_space<vmem>>, %arg3: memref<8x1xf32, #tpu.memory_space<vmem>>, %arg4: memref<27x8xf32, #tpu.memory_space<vmem>>, %arg5: memref<27x128xf32, #tpu.memory_space<vmem>>) attributes {dimension_semantics = [#tpu.dimension_semantics<parallel>], iteration_bounds = array<i64: 1>, scalar_prefetch = 0 : i64, scratch_operands = 0 : i64, tpu.core_type = #tpu.core_type<tc>, window_params = [{transform_indices = @transform_0, window_bounds = array<i64: 128, 27>}, {pipeline_mode = #tpu.pipeline_mode<synchronous>, transform_indices = @transform_1, window_bounds = array<i64: 8, 27>}, {pipeline_mode = #tpu.pipeline_mode<synchronous>, transform_indices = @transform_2, window_bounds = array<i64: 8, 1>}, {pipeline_mode = #tpu.pipeline_mode<synchronous>, transform_indices = @transform_3, window_bounds = array<i64: 27, 8>}, {transform_indices = @transform_4, window_bounds = array<i64: 27, 128>}]} {
    %c0 = arith.constant 0 : index
    %c0_0 = arith.constant 0 : index
    %0 = vector.load %arg2[%c0, %c0_0] : memref<8x27xf32, #tpu.memory_space<vmem>>, vector<8x27xf32>
    %c0_1 = arith.constant 0 : index
    %c0_2 = arith.constant 0 : index
    %1 = vector.load %arg1[%c0_1, %c0_2] : memref<128x27xf32, #tpu.memory_space<vmem>>, vector<128x27xf32>
    %cst = arith.constant dense<0.000000e+00> : vector<8x128xf32>
    %2 = tpu.matmul %0, %1, %cst {dimension_numbers = #tpu.dot_dimension_numbers<[1], [1], [0], [0], [0, 0, 1, 0], [], []>} : vector<8x27xf32>, vector<128x27xf32>, vector<8x128xf32> -> vector<8x128xf32>
    %c0_3 = arith.constant 0 : index
    %c0_4 = arith.constant 0 : index
    %3 = vector.load %arg3[%c0_3, %c0_4] : memref<8x1xf32, #tpu.memory_space<vmem>>, vector<8x1xf32>
    %4 = vector.broadcast %3 : vector<8x1xf32> to vector<8x128xf32>
    %5 = arith.addf %2, %4 : vector<8x128xf32>
    %cst_5 = arith.constant 0.000000e+00 : f32
    %6 = vector.broadcast %cst_5 : f32 to vector<8x128xf32>
    %7 = arith.maximumf %5, %6 : vector<8x128xf32>
    %c0_6 = arith.constant 0 : index
    %c0_7 = arith.constant 0 : index
    %8 = vector.load %arg4[%c0_6, %c0_7] : memref<27x8xf32, #tpu.memory_space<vmem>>, vector<27x8xf32>
    %cst_8 = arith.constant dense<0.000000e+00> : vector<27x128xf32>
    %9 = tpu.matmul %8, %7, %cst_8 {dimension_numbers = #tpu.dot_dimension_numbers<[1], [0], [0], [1], [0, 0, 1, 1], [], []>} : vector<27x8xf32>, vector<8x128xf32>, vector<27x128xf32> -> vector<27x128xf32>
    %c0_9 = arith.constant 0 : index
    %c0_10 = arith.constant 0 : index
    %10 = vector.load %arg5[%c0_9, %c0_10] : memref<27x128xf32, #tpu.memory_space<vmem>>, vector<27x128xf32>
    tpu.vector_store %arg5[%c0_9, %c0_10], %9 {strides = array<i32>} : memref<27x128xf32, #tpu.memory_space<vmem>>, vector<27x128xf32>,
    return
  }
  func.func @transform_0(%arg0: i32) -> (i32, i32) {
    %c0_i32 = arith.constant 0 : i32
    %c0_i32_0 = arith.constant 0 : i32
    return %arg0, %c0_i32 : i32, i32
  }
  func.func @transform_1(%arg0: i32) -> (i32, i32) {
    %c0_i32 = arith.constant 0 : i32
    %c0_i32_0 = arith.constant 0 : i32
    %c0_i32_1 = arith.constant 0 : i32
    return %c0_i32, %c0_i32_0 : i32, i32
  }
  func.func @transform_2(%arg0: i32) -> (i32, i32) {
    %c0_i32 = arith.constant 0 : i32
    %c0_i32_0 = arith.constant 0 : i32
    %c0_i32_1 = arith.constant 0 : i32
    return %c0_i32, %c0_i32_0 : i32, i32
  }
  func.func @transform_3(%arg0: i32) -> (i32, i32) {
    %c0_i32 = arith.constant 0 : i32
    %c0_i32_0 = arith.constant 0 : i32
    %c0_i32_1 = arith.constant 0 : i32
    return %c0_i32, %c0_i32_0 : i32, i32
  }
  func.func @transform_4(%arg0: i32) -> (i32, i32) {
    %c0_i32 = arith.constant 0 : i32
    %c0_i32_0 = arith.constant 0 : i32
    return %c0_i32, %arg0 : i32, i32
  }
}

</mosaic_0001>

<bundles_post_ra>
// kernel: tpu_custom_call.1
= control target key start
LH: loop header
LB: loop body
LE: loop exit
PB: predicated region body
PF: predicated region fallthrough
CT: control target
= control target key end

     0   :  { %vm41_vm0 = vcmask 220160   ;;  %s349_s0 = inlined_call_operand.vmem [shape: f32[128,27], index: 0, kind: input, shape index: {}]   ;;  %s350_s1 = inlined_call_operand.vmem [shape: f32[8,27], index: 1, kind: input, shape index: {}]   ;;  %s351_s2 = inlined_call_operand.vmem [shape: f32[8,1], index: 2, kind: input, shape index: {}]   ;;  %s352_s3 = inlined_call_operand.vmem [shape: f32[27,8], index: 3, kind: input, shape index: {}]   ;;  %s353_s4 = inlined_call_operand.hbm [shape: f32[27,128], index: 4, kind: output, shape index: {}]  }
   0x1   :  { %v34_v0 = vld [vmem:[%s349_s0 + $0x78] sm:$0xff]  ;;  %v33_v1 = vld [vmem:[%s349_s0 + $0x70] sm:$0xff] }
   0x2   :  { %182 = vmatpush.xpose.msk.msra.mxu0 %vm41_vm0, %v34_v0 }
   0x3   :  { %9 = vsyncpa [#allocation3], 0  ;;  %v32_v2 = vld [vmem:[%s349_s0 + $0x68] sm:$0xff]  ;;  %v31_v3 = vld [vmem:[%s349_s0 + $0x60] sm:$0xff]  ;;  %v234_v10 = vmov 0   ;;  %vm118_vm1 = vcmask 64512  }
   0x4   :  { %v30_v4 = vld [vmem:[%s349_s0 + $0x58] sm:$0xff]  ;;  %v29_v5 = vld [vmem:[%s349_s0 + $0x50] sm:$0xff]  ;;  %v28_v6 = vld [vmem:[%s349_s0 + $0x48] sm:$0xff]  ;;  %207 = vset.pattern.permute.xlu0 %v234_v10  ;;  %s235_s30 = smov [#allocation2]   ;;  %s170_s8 = sshll.u32 %s353_s4, 4  ;;  %s171_s8 = int_to_ptr.hbm [resolvable:$true] %s170_s8 }
   0x5   :  { %v27_v7 = vld [vmem:[%s349_s0 + $0x40] sm:$0xff]  ;;  %v26_v8 = vld [vmem:[%s349_s0 + $0x38] sm:$0xff]  ;;  %v25_v11 = vld [vmem:[%s349_s0 + $0x30] sm:$0xff]  ;;  %s168_s5 = sshll.u32 %s235_s30, 4  ;;  %s236_s9 = smov 128   ;;  %s169_s5 = int_to_ptr.vmem [resolvable:$true] %s168_s5 }
   0x6   :  { %183 = vmatpush.xpose.msk.msra.mxu0 %vm41_vm0, %v33_v1  ;;  %v35_v9 = vld [vmem:[%s351_s2] sm:$0xff]  ;;  %v24_v12 = vld [vmem:[%s349_s0 + $0x28] sm:$0xff]  ;;  %v22_v14 = vld [vmem:[%s349_s0 + $0x18] sm:$0xff]  ;;  %s237_s10 = smov 8  }
   0x7   :  { %38 = vperm.xlu0 %207, %v35_v9   ;;  %v23_v13 = vld [vmem:[%s349_s0 + $0x20] sm:$0xff]  ;;  %v21_v15 = vld [vmem:[%s349_s0 + $0x10] sm:$0xff]  ;;  %v20_v16 = vld [vmem:[%s349_s0 + $0x8] sm:$0xff] }
   0x8   :  { %v19_v17 = vld [vmem:[%s349_s0] sm:$0xff]  ;;  %v115_v24 = vld [vmem:[%s352_s3 + $0x8] sm:$0xff]  ;;  %v116_v25 = vld [vmem:[%s352_s3 + $0x10] sm:$0xff] }
   0x9   :  { %v18_v18 = vld [vmem:[%s350_s1] sm:$0xff]  ;;  %v117_v26 = vld [vmem:[%s352_s3 + $0x18] sm:$0x7] }
   0xa   :  { %184 = vmatpush.xpose.msk.msra.mxu0 %vm41_vm0, %v32_v2  ;;  %v114_v23 = vld [vmem:[%s352_s3] sm:$0xff] }
   0xe   :  { %185 = vmatpush.xpose.msk.msra.mxu0 %vm41_vm0, %v31_v3 }
  0x12   :  { %186 = vmatpush.xpose.msk.msra.mxu0 %vm41_vm0, %v30_v4 }
  0x16   :  { %187 = vmatpush.xpose.msk.msra.mxu0 %vm41_vm0, %v29_v5 }
  0x1a   :  { %188 = vmatpush.xpose.msk.msra.mxu0 %vm41_vm0, %v28_v6 }
  0x1e   :  { %189 = vmatpush.xpose.msk.msra.mxu0 %vm41_vm0, %v27_v7 }
  0x22   :  { %190 = vmatpush.xpose.msk.msra.mxu0 %vm41_vm0, %v26_v8 }
  0x26   :  { %191 = vmatpush.xpose.msk.msra.mxu0 %vm41_vm0, %v25_v11 }
  0x2a   :  { %192 = vmatpush.xpose.msk.msra.mxu0 %vm41_vm0, %v24_v12 }
  0x2e   :  { %193 = vmatpush.xpose.msk.msra.mxu0 %vm41_vm0, %v23_v13 }
  0x32   :  { %194 = vmatpush.xpose.msk.msra.mxu0 %vm41_vm0, %v22_v14 }
  0x36   :  { %195 = vmatpush.xpose.msk.msra.mxu0 %vm41_vm0, %v21_v15 }
  0x3a   :  { %196 = vmatpush.xpose.msk.msra.mxu0 %vm41_vm0, %v20_v16 }
  0x3e   :  { %197 = vmatpush.xpose.msk.msra.mxu0 %vm41_vm0, %v19_v17 }
  0x41   :  { %198 = vmatmul.msk.f32.vlgmr.msra.gmra.mxu0 %vm41_vm0, %v18_v18 }
  0x79   :  { %v39_v19 = vpop.permute.xlu0 %38 }
  0xbe   :  { %v110_v20 = vpop.f32.mrf.mxu0 }
  0xbf   :  { %v111_v21 = vadd.f32 %v110_v20, %v39_v19 }
  0xc1   :  { %v113_v22 = vmax.f32 %v111_v21, 0.0 }
  0xc3   :  { %146 = vmatpush.msra.mxu1 %v113_v22 }
  0xc4   :  { %199 = vmatmul.msk.f32.vlgmr.msra.gmra.mxu1 %vm118_vm1, %v114_v23 }
  0xcc   :  { %200 = vmatmul.msk.f32.gmra.mxu1 %vm118_vm1, %v115_v24 }
  0xd4   :  { %201 = vmatmul.msk.f32.gmra.mxu1 %vm118_vm1, %v116_v25 }
  0xdc   :  { %202 = vmatmul.msk.f32.gmra.mxu1 %vm118_vm1, %v117_v26 }
 0x141   :  { %v148_v27 = vpop.f32.mrf.mxu1 }
 0x142   :  { %160 = vst [vmem:[#allocation2] sm:$0xff] %v148_v27 }
 0x149   :  { %v151_v28 = vpop.f32.mrf.mxu1 }
 0x14a   :  { %161 = vst [vmem:[#allocation2 + $0x8] sm:$0xff] %v151_v28 }
 0x151   :  { %v154_v29 = vpop.f32.mrf.mxu1 }
 0x152   :  { %162 = vst [vmem:[#allocation2 + $0x10] sm:$0xff] %v154_v29 }
 0x159   :  { %v157_v30 = vpop.f32.mrf.mxu1 }
 0x15a   :  { %163 = vst [vmem:[#allocation2 + $0x18] sm:$0x7] %v157_v30 }
 0x15b   :  { %176 = dma.vmem_to_hbm [thread:$0]  %s169_s5, 512, %s171_s8, [#allocation3], %s236_s9, %s236_s9, %s237_s10  }
 0x15c   :  { %232 = dma.done.wait [#allocation3], 512  }
 0x15d   :  { %233 = vsyncadd [#allocation3], 4294966784 }
 0x15e   :  { %181 = vsyncpa [#allocation3], 1 }

</bundles_post_ra>
